<compile_context>
chip_gen: v7x
topology: tpu7x:2x2x1
jax: 0.10.0
libtpu: 0.0.40
codegen_flags: <defaults>
</compile_context>

<pallas_src>
import jax
import jax.numpy as jnp
from jax.experimental import pallas as pl
from jax.experimental.pallas import tpu as pltpu  # noqa: F401  (kept for parity / future tuning)


def mlp_kernel(x_ref, w1_ref, b1_ref, w2_ref, b2_ref, w3t_ref, b3_ref, o_ref):
    x = x_ref[...]                                              # (1, Np)

    # fc1 + relu: degenerate K=1 matmul -> VPU broadcast multiply-add.
    h1 = jnp.maximum(w1_ref[...] * x + b1_ref[...], 0.0)        # (15, Np)

    # fc2 + relu: the only real matmul, keep it on the MXU.
    h2 = jnp.dot(w2_ref[...], h1, preferred_element_type=jnp.float32)
    h2 = jnp.maximum(h2 + b2_ref[...], 0.0)                     # (30, Np)

    # fc3: degenerate M=1 matmul -> elementwise mul + sublane (XLU) reduce.
    out = jnp.sum(h2 * w3t_ref[...], axis=0, keepdims=True) + b3_ref[...]  # (1, Np)

    o_ref[...] = out.astype(o_ref.dtype)


def net_forward(x, params):
    """x: (N, 1) float32. Returns (N, 1) float32, matching the PyTorch Net."""
    w1, b1, w2, b2, w3, b3 = params
    N = x.shape[0]
    # Pad the batch (lane) axis to a multiple of 128 so the output is a fully
    # unmasked lane-dense slab.
    Np = ((N + 127) // 128) * 128

    # Transposed, lane-dense input: (1, Np), zero-padded tail (sliced off below).
    xt = jnp.zeros((1, Np), jnp.float32).at[0, :N].set(x[:, 0])

    # Column-vector biases broadcast along lanes; w3 transposed to (30, 1).
    b1c = b1.reshape(15, 1)
    b2c = b2.reshape(30, 1)
    w3t = w3.reshape(30, 1)
    b3c = b3.reshape(1, 1)

    full = lambda a: pl.BlockSpec(a.shape, lambda: (0,) * a.ndim)

    out = pl.pallas_call(
        mlp_kernel,
        out_shape=jax.ShapeDtypeStruct((1, Np), jnp.float32),
        in_specs=[
            full(xt),
            full(w1), full(b1c),
            full(w2), full(b2c),
            full(w3t), full(b3c),
        ],
        out_specs=pl.BlockSpec((1, Np), lambda: (0, 0)),
    )(xt, w1, b1c, w2, b2c, w3t, b3c)

    return out[0, :N].reshape(N, 1)


def init_params(key):
    """PyTorch-Linear-style init: U(-1/sqrt(fan_in), 1/sqrt(fan_in)).
    Weights are stored in native PyTorch layout (out_features, in_features)."""
    def linear(key, fan_in, fan_out):
        kw, kb = jax.random.split(key)
        bound = 1.0 / jnp.sqrt(float(fan_in))
        w = jax.random.uniform(kw, (fan_out, fan_in), jnp.float32, -bound, bound)
        b = jax.random.uniform(kb, (fan_out,), jnp.float32, -bound, bound)
        return w, b

    k1, k2, k3 = jax.random.split(key, 3)
    w1, b1 = linear(k1, 1, 15)
    w2, b2 = linear(k2, 15, 30)
    w3, b3 = linear(k3, 30, 1)
    return (w1, b1, w2, b2, w3, b3)


def net_forward_ref(x, params):
    """Pure-JAX reference in standard (N, F) layout with PyTorch semantics."""
    w1, b1, w2, b2, w3, b3 = params
    h1 = jnp.maximum(x @ w1.T + b1, 0.0)
    h2 = jnp.maximum(h1 @ w2.T + b2, 0.0)
    return h2 @ w3.T + b3


if __name__ == "__main__":
    key = jax.random.PRNGKey(0)
    params = init_params(key)

    # Input matching the original script: x = linspace(-1, 1, 200)[:, None]
    x = jnp.linspace(-1.0, 1.0, 200, dtype=jnp.float32).reshape(200, 1)

    out = net_forward(x, params)
    out = jax.block_until_ready(out)

    ref = net_forward_ref(x, params)
    assert out.shape == (200, 1), out.shape
    assert jnp.allclose(out, ref, atol=1e-5, rtol=1e-5), "mismatch vs reference"

    print("KERNEL_OK")
</pallas_src>

<mosaic_0001>
module attributes {stable_mosaic.version = 11 : i64} {
  func.func @mlp_kernel(%arg0: memref<1x256xf32, #tpu.memory_space<vmem>>, %arg1: memref<15x1xf32, #tpu.memory_space<vmem>>, %arg2: memref<15x1xf32, #tpu.memory_space<vmem>>, %arg3: memref<30x15xf32, #tpu.memory_space<vmem>>, %arg4: memref<30x1xf32, #tpu.memory_space<vmem>>, %arg5: memref<30x1xf32, #tpu.memory_space<vmem>>, %arg6: memref<1x1xf32, #tpu.memory_space<vmem>>, %arg7: memref<1x256xf32, #tpu.memory_space<vmem>>) attributes {dimension_semantics = [], scalar_prefetch = 0 : i64, scratch_operands = 0 : i64, tpu.core_type = #tpu.core_type<tc>} {
    %c0 = arith.constant 0 : index
    %c0_0 = arith.constant 0 : index
    %0 = vector.load %arg0[%c0, %c0_0] : memref<1x256xf32, #tpu.memory_space<vmem>>, vector<1x256xf32>
    %c0_1 = arith.constant 0 : index
    %c0_2 = arith.constant 0 : index
    %1 = vector.load %arg1[%c0_1, %c0_2] : memref<15x1xf32, #tpu.memory_space<vmem>>, vector<15x1xf32>
    %2 = vector.broadcast %1 : vector<15x1xf32> to vector<15x256xf32>
    %3 = vector.broadcast %0 : vector<1x256xf32> to vector<15x256xf32>
    %4 = arith.mulf %2, %3 : vector<15x256xf32>
    %c0_3 = arith.constant 0 : index
    %c0_4 = arith.constant 0 : index
    %5 = vector.load %arg2[%c0_3, %c0_4] : memref<15x1xf32, #tpu.memory_space<vmem>>, vector<15x1xf32>
    %6 = vector.broadcast %5 : vector<15x1xf32> to vector<15x256xf32>
    %7 = arith.addf %4, %6 : vector<15x256xf32>
    %cst = arith.constant 0.000000e+00 : f32
    %8 = vector.broadcast %cst : f32 to vector<15x256xf32>
    %9 = arith.maximumf %7, %8 : vector<15x256xf32>
    %c0_5 = arith.constant 0 : index
    %c0_6 = arith.constant 0 : index
    %10 = vector.load %arg3[%c0_5, %c0_6] : memref<30x15xf32, #tpu.memory_space<vmem>>, vector<30x15xf32>
    %cst_7 = arith.constant dense<0.000000e+00> : vector<30x256xf32>
    %11 = tpu.matmul %10, %9, %cst_7 {dimension_numbers = #tpu.dot_dimension_numbers<[1], [0], [0], [1], [0, 0, 1, 1], [], []>} : vector<30x15xf32>, vector<15x256xf32>, vector<30x256xf32> -> vector<30x256xf32>
    %c0_8 = arith.constant 0 : index
    %c0_9 = arith.constant 0 : index
    %12 = vector.load %arg4[%c0_8, %c0_9] : memref<30x1xf32, #tpu.memory_space<vmem>>, vector<30x1xf32>
    %13 = vector.broadcast %12 : vector<30x1xf32> to vector<30x256xf32>
    %14 = arith.addf %11, %13 : vector<30x256xf32>
    %cst_10 = arith.constant 0.000000e+00 : f32
    %15 = vector.broadcast %cst_10 : f32 to vector<30x256xf32>
    %16 = arith.maximumf %14, %15 : vector<30x256xf32>
    %c0_11 = arith.constant 0 : index
    %c0_12 = arith.constant 0 : index
    %17 = vector.load %arg5[%c0_11, %c0_12] : memref<30x1xf32, #tpu.memory_space<vmem>>, vector<30x1xf32>
    %18 = vector.broadcast %17 : vector<30x1xf32> to vector<30x256xf32>
    %19 = arith.mulf %16, %18 : vector<30x256xf32>
    %cst_13 = arith.constant dense<0.000000e+00> : vector<256xf32>
    %20 = vector.multi_reduction <add>, %19, %cst_13 [0] : vector<30x256xf32> to vector<256xf32>
    %21 = vector.shape_cast %20 : vector<256xf32> to vector<1x256xf32>
    %c0_14 = arith.constant 0 : index
    %c0_15 = arith.constant 0 : index
    %22 = vector.load %arg6[%c0_14, %c0_15] : memref<1x1xf32, #tpu.memory_space<vmem>>, vector<1x1xf32>
    %23 = vector.broadcast %22 : vector<1x1xf32> to vector<1x256xf32>
    %24 = arith.addf %21, %23 : vector<1x256xf32>
    %c0_16 = arith.constant 0 : index
    %c0_17 = arith.constant 0 : index
    %25 = vector.load %arg7[%c0_16, %c0_17] : memref<1x256xf32, #tpu.memory_space<vmem>>, vector<1x256xf32>
    tpu.vector_store %arg7[%c0_16, %c0_17], %24 {strides = array<i32>} : memref<1x256xf32, #tpu.memory_space<vmem>>, vector<1x256xf32>,
    return
  }
}

</mosaic_0001>

<bundles_post_ra>
// kernel: tpu_custom_call.1
= control target key start
LH: loop header
LB: loop body
LE: loop exit
PB: predicated region body
PF: predicated region fallthrough
CT: control target
= control target key end

     0   :  { %s491_s0 = inlined_call_operand.vmem [shape: f32[1,256], index: 0, kind: input, shape index: {}]   ;;  %s492_s1 = inlined_call_operand.vmem [shape: f32[15,1], index: 1, kind: input, shape index: {}]   ;;  %s493_s2 = inlined_call_operand.vmem [shape: f32[15,1], index: 2, kind: input, shape index: {}]   ;;  %s494_s3 = inlined_call_operand.vmem [shape: f32[30,15], index: 3, kind: input, shape index: {}]   ;;  %s495_s4 = inlined_call_operand.vmem [shape: f32[30,1], index: 4, kind: input, shape index: {}]   ;;  %s496_s5 = inlined_call_operand.vmem [shape: f32[30,1], index: 5, kind: input, shape index: {}]   ;;  %s497_s6 = inlined_call_operand.<no memory space> [shape: f32[1,1], index: 6, kind: input, shape index: {}]   ;;  %s498_s7 = inlined_call_operand.hbm [shape: f32[1,256], index: 7, kind: output, shape index: {}]  }
   0x1   :  { %v12_v0 = vstv %s497_s6 }
   0x2   :  { %13 = vst [vmem:[#allocation2] sm:$0x1] %v12_v0 }
   0x3   :  { %v57_v1 = vld [vmem:[%s493_s2] sm:$0xff]  ;;  %v369_v3 = vmov 0   ;;  %v58_v4 = vld [vmem:[%s493_s2 + $0x8] sm:$0x7f] }
   0x4   :  { %v30_v2 = vld [vmem:[%s492_s1] sm:$0xff]  ;;  %344 = vset.pattern.permute.xlu1 %v369_v3  ;;  %343 = vset.pattern.permute.xlu0 %v369_v3  ;;  %v31_v5 = vld [vmem:[%s492_s1 + $0x8] sm:$0x7f] }
   0x5   :  { %61 = vperm.xlu1 %344, %v57_v1   ;;  %34 = vperm.xlu0 %343, %v30_v2  }
   0x6   :  { %14 = vsyncpa [#allocation4], 0  ;;  %v82_v6 = vld [vmem:[%s495_s4 + $0x8] sm:$0xff]  ;;  %v81_v7 = vld [vmem:[%s495_s4] sm:$0xff]  ;;  %v370_v12 = vmov 0.0   ;;  %v43_v16 = vlaneseq  ;;  %vm118_vm0 = vcmask 1046528  }
   0x7   :  { %v84_v8 = vld [vmem:[%s495_s4 + $0x18] sm:$0x3f]  ;;  %v83_v9 = vld [vmem:[%s495_s4 + $0x10] sm:$0xff]  ;;  %v223_v10 = vld [vmem:[%s496_s5 + $0x8] sm:$0xff]  ;;  %189 = vmatprep.mubr.f32.mxu0 %v370_v12  ;;  %201 = vmatprep.mubr.f32.mxu1 %v370_v12  ;;  %vm371_vm1 = vmmov 1   ;;  %vm105_vm3 = vcmask 121856  }
   0x8   :  { %v222_v11 = vld [vmem:[%s496_s5] sm:$0xff]  ;;  %v225_v13 = vld [vmem:[%s496_s5 + $0x18] sm:$0x3f]  ;;  %v224_v14 = vld [vmem:[%s496_s5 + $0x10] sm:$0xff]  ;;  %v454_v17 = vshrl.u32 %v43_v16, 7  ;;  %vm256_vm4 = vcmask 1045504  }
   0x9   :  { %66 = vperm.xlu1 %344, %v58_v4   ;;  %39 = vperm.xlu0 %343, %v31_v5   ;;  %v275_v15 = vld [vmem:[#allocation2] sm:$0x1]  ;;  %vm331_vm2 = vmpackc.low %vm118_vm0, %vm371_vm1  ;;  %v79_v42 = vld [vmem:[%s494_s3 + $0x10] sm:$0xff]  ;;  %vm307_vm5 = vcmp.lt.s32.totalorder %v43_v16, 256 }
   0xa   :  { %v45_v18 = vsub.s32 0, %v454_v17  ;;  %v49_v19 = vsub.s32 1, %v454_v17  ;;  %v29_v20 = vld [vmem:[%s491_s0] sm:$0x3]  ;;  %v78_v43 = vld [vmem:[%s494_s3 + $0x8] sm:$0xff] }
   0xb   :  { %v77_v41 = vld [vmem:[%s494_s3] sm:$0xff]  ;;  %v80_v44 = vld [vmem:[%s494_s3 + $0x18] sm:$0x3f]  ;;  %s373_s3 = smov [#allocation3]  }
   0xc   :  { %v46_v21 = vrot.slane %v29_v20, %v45_v18  ;;  %v50_v22 = vrot.slane %v29_v20, %v49_v19  ;;  %s316_s8 = sshll.u32 %s373_s3, 4  ;;  %s317_s8 = int_to_ptr.vmem [resolvable:$true] %s316_s8 }
   0xd   :  { %92 = vperm.xlu1 %344, %v82_v6   ;;  %87 = vperm.xlu0 %343, %v81_v7   ;;  %s345_s9 = scalar_lea.vmem %s317_s8, 32  ;;  %p350_p1 = scmp.lt.s32.totalorder %s317_s8, %s317_s8 }
   0xe   :  { %p346_p0 = scmp.ne.s32.totalorder %s317_s8, %s345_s9  ;;  %p351_p2 = scmp.lt.s32.totalorder %s345_s9, %s345_s9 }
  0x10   :  { %p352_p3 = por %p351_p2, %p350_p1 }
  0x11   :  { %102 = vperm.xlu1 %344, %v84_v8   ;;  %97 = vperm.xlu0 %343, %v83_v9  }
  0x12   :  { %p353_p4 = pnand %p352_p3, %p346_p0 }
  0x15   :  { %233 = vperm.xlu1 %344, %v223_v10   ;;  %228 = vperm.xlu0 %343, %v222_v11  }
  0x19   :  { %243 = vperm.xlu1 %344, %v225_v13   ;;  %238 = vperm.xlu0 %343, %v224_v14  }
  0x1d   :  { %278 = vperm.xlu0 %343, %v275_v15  }
  0x84   :  { %v62_v23 = vpop.permute.xlu1 %61  ;;  %v35_v24 = vpop.permute.xlu0 %34 }
  0x85   :  { %v53_v25 = vmul.f32 %v46_v21, %v35_v24  ;;  %v54_v26 = vmul.f32 %v50_v22, %v35_v24 }
  0x87   :  { %v69_v28 = vadd.f32 %v62_v23, %v53_v25  ;;  %v70_v29 = vadd.f32 %v62_v23, %v54_v26 }
  0x88   :  { %v40_v27 = vpop.permute.xlu0 %39  ;;  %v67_v32 = vpop.permute.xlu1 %66 }
  0x89   :  { %v55_v30 = vmul.f32 %v46_v21, %v40_v27  ;;  %v56_v31 = vmul.f32 %v50_v22, %v40_v27  ;;  %v73_v35 = vmax.f32 %v69_v28, 0.0  ;;  %v74_v37 = vmax.f32 %v70_v29, 0.0 }
  0x8b   :  { %v71_v33 = vadd.f32 %v67_v32, %v55_v30  ;;  %v72_v34 = vadd.f32 %v67_v32, %v56_v31 }
  0x8c   :  { %v93_v45 = vpop.permute.xlu1 %92  ;;  %v88_v46 = vpop.permute.xlu0 %87 }
  0x8d   :  { %v75_v36 = vmax.f32 %v71_v33, 0.0  ;;  %v76_v38 = vmax.f32 %v72_v34, 0.0 }
  0x8f   :  { %v330_v39 = vpack.c.bf16 %v76_v38, %v74_v37  ;;  %v333_v40 = vpack.c.bf16 %v75_v36, %v73_v35  ;;  %v372_v38 = vmov 1966171168  }
  0x90   :  { %v103_v47 = vpop.permute.xlu1 %102  ;;  %v98_v48 = vpop.permute.xlu0 %97 }
  0x91   :  { %332 = vmatprep.subr.msk.bf16.mxu0 %vm331_vm2, %v330_v39  ;;  %336 = vmatprep.subr.msk.bf16.mxu1 %vm331_vm2, %v330_v39  ;;  %v291_v39 = vunpack.c.l.s4 %v372_v38 }
  0x92   :  { %335 = vmatpush1.bf16.msk.msra.mxu0 %vm331_vm2, %v333_v40  ;;  %337 = vmatpush1.bf16.msk.msra.mxu1 %vm331_vm2, %v333_v40 }
  0x94   :  { %v234_v55 = vpop.permute.xlu1 %233  ;;  %v229_v56 = vpop.permute.xlu0 %228 }
  0x95   :  { %326 = vmatmul.mubr.msk.f32.vlgmr.msra.gmra.mrb[0].mxu0 %vm105_vm3, %v77_v41  ;;  %328 = vmatmul.mubr.msk.f32.vlgmr.msra.gmra.mrb[0].mxu1 %vm105_vm3, %v79_v42 }
  0x96   :  { %195 = vmatprep.mubr.f32.mxu0 %v370_v12  ;;  %207 = vmatprep.mubr.f32.mxu1 %v370_v12 }
  0x98   :  { %v244_v11 = vpop.permute.xlu1 %243  ;;  %v239_v14 = vpop.permute.xlu0 %238 }
  0x99   :  { %327 = vmatmul.mubr.msk.f32.gmra.mrb[2].mxu0 %vm105_vm3, %v78_v43  ;;  %329 = vmatmul.mubr.msk.f32.gmra.mrb[2].mxu1 %vm105_vm3, %v80_v44 }
  0x9c   :  { %v279_v41 = vpop.permute.xlu0 %278 }
 0x168   :  { %v191_v49 = vpop.f32.mrb[0].mxu0  ;;  %v203_v50 = vpop.f32.mrb[0].mxu1 }
 0x169   :  { %v192_v51 = vadd.f32 %v191_v49, %v88_v46  ;;  %v193_v52 = vpop.f32.mrb[1].mxu0  ;;  %v205_v53 = vpop.f32.mrb[1].mxu1  ;;  %v204_v57 = vadd.f32 %v203_v50, %v98_v48 }
 0x16a   :  { %v194_v54 = vadd.f32 %v193_v52, %v88_v46  ;;  %v206_v58 = vadd.f32 %v205_v53, %v98_v48  ;;  %v284_v46 = vrot.slane %v279_v41, %v45_v18 }
 0x16b   :  { %v214_v61 = vmax.f32 %v192_v51, 0.0  ;;  %v218_v5 = vmax.f32 %v204_v57, 0.0 }
 0x16c   :  { %v197_v59 = vpop.f32.mrb[2].mxu0  ;;  %v209_v60 = vpop.f32.mrb[2].mxu1  ;;  %v215_v2 = vmax.f32 %v194_v54, 0.0  ;;  %v219_v8 = vmax.f32 %v206_v58, 0.0 }
 0x16d   :  { %v198_v62 = vadd.f32 %v197_v59, %v93_v45  ;;  %v210_v63 = vadd.f32 %v209_v60, %v103_v47  ;;  %v199_v0 = vpop.f32.mrb[3].mxu0  ;;  %v211_v1 = vpop.f32.mrb[3].mxu1  ;;  %v246_v12 = vmul.f32 %v229_v56, %v214_v61  ;;  %v250_v21 = vmul.f32 %v239_v14, %v218_v5 }
 0x16e   :  { %v200_v3 = vadd.f32 %v199_v0, %v93_v45  ;;  %v212_v4 = vadd.f32 %v211_v1, %v103_v47  ;;  %v247_v15 = vmul.f32 %v229_v56, %v215_v2  ;;  %v251_v24 = vmul.f32 %v239_v14, %v219_v8 }
 0x16f   :  { %v216_v6 = vmax.f32 %v198_v62, 0.0  ;;  %v220_v7 = vmax.f32 %v210_v63, 0.0  ;;  %v292_v45 = vunpack.c.0.s8 %v291_v39 }
 0x170   :  { %v217_v9 = vmax.f32 %v200_v3, 0.0  ;;  %v221_v10 = vmax.f32 %v212_v4, 0.0 }
 0x171   :  { %v248_v13 = vmul.f32 %v234_v55, %v216_v6  ;;  %v252_v19 = vmul.f32 %v244_v11, %v220_v7  ;;  %v295_v51 = vsub.s32 %v292_v45, %v454_v17 }
 0x172   :  { %v249_v20 = vmul.f32 %v234_v55, %v217_v9  ;;  %v253_v23 = vmul.f32 %v244_v11, %v221_v10 }
 0x173   :  { %v254_v22 = vadd.f32 %v248_v13, %v246_v12  ;;  %v257_v27 = vsel %vm256_vm4, %v252_v19, 0.0 }
 0x174   :  { %v265_v25 = vadd.f32 %v249_v20, %v247_v15  ;;  %v267_v30 = vsel %vm256_vm4, %v253_v23, 0.0 }
 0x175   :  { %v255_v26 = vadd.f32 %v254_v22, %v250_v21 }
 0x176   :  { %v266_v28 = vadd.f32 %v265_v25, %v251_v24 }
 0x177   :  { %v258_v29 = vadd.f32 %v257_v27, %v255_v26 }
 0x178   :  { %v268_v31 = vadd.f32 %v267_v30, %v266_v28 }
 0x179   :  { %v259_v32 = vrot.slane %v258_v29, 4 }
 0x17a   :  { %v269_v33 = vrot.slane %v268_v31, 4 }
 0x17b   :  { %v260_v34 = vadd.f32 %v259_v32, %v258_v29 }
 0x17c   :  { %v270_v35 = vadd.f32 %v269_v33, %v268_v31 }
 0x17d   :  { %v261_v36 = vrot.slane %v260_v34, 2 }
 0x17e   :  { %v271_v37 = vrot.slane %v270_v35, 2 }
 0x17f   :  { %v262_v40 = vadd.f32 %v261_v36, %v260_v34 }
 0x180   :  { %v272_v42 = vadd.f32 %v271_v37, %v270_v35 }
 0x181   :  { %v263_v43 = vrot.slane %v262_v40, 1 }
 0x182   :  { %v273_v44 = vrot.slane %v272_v42, 1 }
 0x183   :  { %v264_v47 = vadd.f32 %v263_v43, %v262_v40 }
 0x184   :  { %v274_v48 = vadd.f32 %v273_v44, %v272_v42 }
 0x185   :  { %v285_v49 = vadd.f32 %v284_v46, %v264_v47 }
 0x186   :  { %v286_v50 = vadd.f32 %v284_v46, %v274_v48 }
 0x188   :  { %v289_v52 = vcombine.low %v285_v49, %v286_v50 }
 0x18a   :  { %v296_v53 = vrot.slane %v289_v52, %v295_v51 }
 0x18c   :  { %v303_v54 = vrot.slane %v296_v53, %v295_v51 }
 0x18e   :  { %309 = vst.msk [vmem:[#allocation3] sm:$0x3] %vm307_vm5, %v303_v54 }
 0x18f   :  { %356 = shalt.err (!%p353_p4)
}
 0x190   :  { %s357_s11 = scalar_lea.hbm %s498_s7, 32 }
 0x191   :  { %p358_p5 = scmp.ne.s32.totalorder %s498_s7, %s357_s11  ;;  %p361_p6 = scmp.lt.u32.totalorder %s357_s11, %s498_s7 }
 0x193   :  { %p363_p7 = pnand %p361_p6, %p358_p5 }
 0x195   :  { %366 = shalt.err (!%p363_p7)
}
 0x196   :  { %319 = dma.vmem_to_hbm [thread:$0]  %s317_s8, 32, %s498_s7, [#allocation4]  }
 0x197   :  { %367 = dma.done.wait [#allocation4], 32  }
 0x198   :  { %368 = vsyncadd [#allocation4], 4294967264 }
 0x199   :  { %323 = vsyncpa [#allocation4], 1 }

</bundles_post_ra>
